<compile_context>
chip_gen: v7x
topology: tpu7x:2x2x1
jax: 0.10.0
libtpu: 0.0.40
codegen_flags: <defaults>
</compile_context>

<pallas_src>
import functools

import numpy as np

import jax
import jax.numpy as jnp
from jax.experimental import pallas as pl
from jax.experimental.pallas import tpu as pltpu


# ---------------------------------------------------------------------------
# Kernel 1: fused node-level projections
# ---------------------------------------------------------------------------
def gipa_proj_kernel(x_ref, w_ref, b_ref, fsrc_ref, fdst_ref, attn_ref,
                     *, n_heads, out_feats):
    """One wide matmul x @ [w_src | w_dst | w_attn_src | w_attn_dst], split after."""
    hf = n_heads * out_feats
    y = jnp.dot(x_ref[...], w_ref[...], preferred_element_type=jnp.float32)
    fsrc_ref[...] = y[:, :hf].astype(jnp.bfloat16)        # src_fc -> bf16 for MXU agg
    fdst_ref[...] = y[:, hf:2 * hf] + b_ref[...]          # dst_fc (residual) + bias
    attn_ref[...] = y[:, 2 * hf:2 * hf + 2 * n_heads]     # [attn_src | attn_dst]


# ---------------------------------------------------------------------------
# Kernel 2: edge attention + adjacency-masked aggregation + residual
# (compressed 1-D grid; scalar-prefetch refs come first)
# ---------------------------------------------------------------------------
def gipa_agg_kernel(ti_ref, tj_ref, first_ref, last_ref,
                    adj_ref, edge_ref, asrcT_ref, adst_ref, fsrc_ref, fdst_ref,
                    w_ae_ref, out_ref, *, n_heads, out_feats, neg_slope):
    s = pl.program_id(0)

    @pl.when(first_ref[s] == 1)
    def _init():
        out_ref[...] = jnp.zeros_like(out_ref)     # out block = f32 accumulator

    adj = adj_ref[...].astype(jnp.float32)          # [TM, TN]  0/1 (exact in bf16)
    asrc_t = asrcT_ref[...]                         # [H, TN]   f32
    adst = adst_ref[...]                            # [TM, H]   f32
    fsrc = fsrc_ref[...]                            # [TN, H*F] bf16
    de = edge_ref.shape[0]

    # attn_edge weighted sum: d outer / h inner so each bf16 edge plane is
    # loaded & upcast to f32 exactly once (SMEM scalar FMAs, f32 accumulation).
    ae = [None] * n_heads
    for d in range(de):                             # static unroll, De is small
        ed = edge_ref[d].astype(jnp.float32)        # [TM, TN] f32
        for h in range(n_heads):
            term = w_ae_ref[h, d] * ed
            ae[h] = term if ae[h] is None else ae[h] + term

    head_aggs = []
    for h in range(n_heads):                        # static unroll, H is small
        sc = adst[:, h:h + 1] + asrc_t[h:h + 1, :] + ae[h]       # u_add_v + edge
        e = jnp.where(sc >= 0, sc, neg_slope * sc)               # LeakyReLU (f32)
        a = adj * e                                              # mask fused as multiply
        head_aggs.append(
            jnp.dot(a.astype(jnp.bfloat16),
                    fsrc[:, h * out_feats:(h + 1) * out_feats],
                    preferred_element_type=jnp.float32))         # MXU, f32 accumulate
    # single lane-contiguous [TM, H*F] accumulate per grid step
    out_ref[...] += jnp.concatenate(head_aggs, axis=-1)
    # TODO(synk): pad H*F to a 128-lane multiple for unmasked stores (mainly v5e).

    @pl.when(last_ref[s] == 1)
    def _fin():
        out_ref[...] = out_ref[...] + fdst_ref[...]   # residual (dst_fc + bias)


# ---------------------------------------------------------------------------
# Host-side compressed tile schedule (only non-empty adjacency tiles)
# ---------------------------------------------------------------------------
def _tile_schedule(adj, tm, tn):
    """Return (tile_i, tile_j, first, last) int32 arrays for the compressed grid.

    Every row tile is included at least once (with j=0) so its accumulator is
    initialized and the residual written even for zero-in-degree row tiles.
    """
    n = adj.shape[0]
    gi, gj = n // tm, n // tn
    nz = (np.asarray(adj) != 0).reshape(gi, tm, gj, tn).any(axis=(1, 3))
    ti, tj, first, last = [], [], [], []
    for i in range(gi):
        cols = np.nonzero(nz[i])[0].tolist() or [0]
        for k, j in enumerate(cols):
            ti.append(i)
            tj.append(j)
            first.append(1 if k == 0 else 0)
            last.append(1 if k == len(cols) - 1 else 0)
    as_i32 = lambda x: jnp.asarray(np.asarray(x, dtype=np.int32))
    return as_i32(ti), as_i32(tj), as_i32(first), as_i32(last)


# --------------------------------- wrapper -----------------------------------
def gipa_forward(feat_src, adj, edge_feat_dT, params, *, n_heads, out_feats,
                 neg_slope=0.2, tm=256, tn=512):
    # Tile sizes: 256-512 per measured mem-bound scaling (128~29%, 256~63%,
    # 512~85% of HBM roofline).  With bf16 edges the double-buffered working
    # set at 512x512 is ~12-14 MiB, so a 48 MiB scoped-VMEM limit fits
    # v5e/v6e (128 MiB physical) and v7x (64 MiB).  Keep n//tm >= 2 on v7x.
    n, dn = feat_src.shape
    de = edge_feat_dT.shape[0]
    hf = n_heads * out_feats
    tm, tn = min(tm, n), min(tn, n)
    assert n % tm == 0 and n % tn == 0  # TODO(synk): pad ragged node counts

    # narrow HBM storage for the dominant streams (exact for 0/1 adjacency)
    adj_bf = adj if adj.dtype == jnp.bfloat16 else adj.astype(jnp.bfloat16)
    edge_bf = (edge_feat_dT if edge_feat_dT.dtype == jnp.bfloat16
               else edge_feat_dT.astype(jnp.bfloat16))

    # ---- kernel 1: fused projections ------------------------------------
    w_all = jnp.concatenate([params["w_src"], params["w_dst"],
                             params["w_attn_src"], params["w_attn_dst"]], axis=1)
    fsrc_bf, fdst, attn = pl.pallas_call(
        functools.partial(gipa_proj_kernel, n_heads=n_heads, out_feats=out_feats),
        grid=(n // tm,),
        in_specs=[
            pl.BlockSpec((tm, dn), lambda i: (i, 0)),
            pl.BlockSpec((dn, 2 * hf + 2 * n_heads), lambda i: (0, 0)),
            pl.BlockSpec((1, hf), lambda i: (0, 0)),
        ],
        out_specs=(
            pl.BlockSpec((tm, hf), lambda i: (i, 0)),
            pl.BlockSpec((tm, hf), lambda i: (i, 0)),
            pl.BlockSpec((tm, 2 * n_heads), lambda i: (i, 0)),
        ),
        out_shape=(
            jax.ShapeDtypeStruct((n, hf), jnp.bfloat16),
            jax.ShapeDtypeStruct((n, hf), jnp.float32),
            jax.ShapeDtypeStruct((n, 2 * n_heads), jnp.float32),
        ),
        compiler_params=pltpu.CompilerParams(dimension_semantics=("parallel",)),
    )(feat_src, w_all, params["b_dst"])

    asrc_t = attn[:, :n_heads].T      # [H, N]: lane-dense attn_src rows (tiny XLA glue)
    adst = attn[:, n_heads:]          # [N, H]

    # ---- kernel 2: compressed-grid edge attention + aggregation ----------
    ti, tj, first, last = _tile_schedule(adj, tm, tn)
    num_steps = int(ti.shape[0])

    grid_spec = pltpu.PrefetchScalarGridSpec(
        num_scalar_prefetch=4,
        grid=(num_steps,),
        in_specs=[
            pl.BlockSpec((tm, tn),
                         lambda s, ti_r, tj_r, fi_r, la_r: (ti_r[s], tj_r[s])),     # adj
            pl.BlockSpec((de, tm, tn),
                         lambda s, ti_r, tj_r, fi_r, la_r: (0, ti_r[s], tj_r[s])),  # edge
            pl.BlockSpec((n_heads, tn),
                         lambda s, ti_r, tj_r, fi_r, la_r: (0, tj_r[s])),           # attn_src^T
            pl.BlockSpec((tm, n_heads),
                         lambda s, ti_r, tj_r, fi_r, la_r: (ti_r[s], 0)),           # attn_dst
            pl.BlockSpec((tn, hf),
                         lambda s, ti_r, tj_r, fi_r, la_r: (tj_r[s], 0)),           # feat_src_fc
            pl.BlockSpec((tm, hf),
                         lambda s, ti_r, tj_r, fi_r, la_r: (ti_r[s], 0)),           # feat_dst_fc
            pl.BlockSpec(memory_space=pltpu.MemorySpace.SMEM),                      # w_attn_edge
        ],
        out_specs=pl.BlockSpec((tm, hf),
                               lambda s, ti_r, tj_r, fi_r, la_r: (ti_r[s], 0)),
    )
    # TODO(synk): pipeline_mode=pl.Buffered(3) on adj/edge specs if DMA gaps
    #             remain exposed after the larger tiles.
    out = pl.pallas_call(
        functools.partial(gipa_agg_kernel, n_heads=n_heads, out_feats=out_feats,
                          neg_slope=neg_slope),
        grid_spec=grid_spec,
        out_shape=jax.ShapeDtypeStruct((n, hf), jnp.float32),
        compiler_params=pltpu.CompilerParams(
            dimension_semantics=("arbitrary",),
            vmem_limit_bytes=48 * 1024 * 1024),
    )(ti, tj, first, last,
      adj_bf, edge_bf, asrc_t, adst, fsrc_bf, fdst, params["w_attn_edge"])

    return out.reshape(n, n_heads, out_feats)


# ------------------------- pure-JAX reference --------------------------------
def gipa_reference(feat_src, adj, edge_feat_dT, params, *, n_heads, out_feats,
                   neg_slope=0.2):
    # Mirrors the kernel's intentional mixed precision (bf16 edge storage and
    # bf16 at the MXU boundary); everything else in accurate f32.
    P = jax.lax.Precision.HIGHEST
    adj_f = adj.astype(jnp.float32)
    edge_f = edge_feat_dT.astype(jnp.float32)
    fsrc = jnp.dot(feat_src, params["w_src"], precision=P)
    fsrc = fsrc.astype(jnp.bfloat16).astype(jnp.float32)
    fdst = jnp.dot(feat_src, params["w_dst"], precision=P) + params["b_dst"]
    asrc = jnp.dot(feat_src, params["w_attn_src"], precision=P)        # [N, H]
    adst = jnp.dot(feat_src, params["w_attn_dst"], precision=P)        # [N, H]
    ae = jnp.einsum('hd,dvu->vuh', params["w_attn_edge"], edge_f,
                    precision=P)                                       # [N, N, H]
    s = asrc[None, :, :] + adst[:, None, :] + ae
    e = jnp.where(s >= 0, s, neg_slope * s)
    a = adj_f[:, :, None] * e
    a = a.astype(jnp.bfloat16).astype(jnp.float32)
    agg = jnp.einsum('vuh,uhf->vhf', a,
                     fsrc.reshape(-1, n_heads, out_feats), precision=P)
    return agg + fdst.reshape(-1, n_heads, out_feats)


# ----------------------------- param init ------------------------------------
def xavier_normal(key, shape, gain):
    fan_out, fan_in = shape[0], shape[1]
    std = gain * (2.0 / (fan_in + fan_out)) ** 0.5
    return std * jax.random.normal(key, shape, dtype=jnp.float32)


def init_params(key, node_feats, edge_feats, out_feats, n_heads):
    gain = 2.0 ** 0.5  # calculate_gain('relu')
    hf = out_feats * n_heads
    k = jax.random.split(key, 5)
    # nn.Linear weights are [out, in]; store transposed ([in, out]).
    w_src_t  = xavier_normal(k[0], (hf, node_feats), gain)       # src_fc.weight
    w_dst_t  = xavier_normal(k[1], (hf, node_feats), gain)       # dst_fc.weight
    w_asrc   = xavier_normal(k[2], (n_heads, node_feats), gain)  # attn_src_fc.weight
    w_adst   = xavier_normal(k[3], (n_heads, node_feats), gain)  # attn_dst_fc.weight
    w_aedge  = xavier_normal(k[4], (n_heads, edge_feats), gain)  # attn_edge_fc.weight
    return {
        "w_src": w_src_t.T,                          # [Dn, H*F]
        "w_dst": w_dst_t.T,                          # [Dn, H*F]
        "b_dst": jnp.zeros((1, hf), jnp.float32),    # dst_fc.bias (zero-init)
        "w_attn_src": w_asrc.T,                      # [Dn, H]
        "w_attn_dst": w_adst.T,                      # [Dn, H]
        "w_attn_edge": w_aedge,                      # [H, De]
    }


# --------------------------------- main ---------------------------------------
if __name__ == "__main__":
    N          = 768   # 3x3 tiles at tm=tn=256: exercises multi-step reduction,
                       # empty-tile skipping, and the zero-in-degree residual path
    NODE_FEATS = 16
    EDGE_FEATS = 8
    OUT_FEATS  = 16
    N_HEADS    = 2

    key = jax.random.PRNGKey(0)
    k_feat, k_adj, k_edge, k_param = jax.random.split(key, 4)

    feat_src = jax.random.normal(k_feat, (N, NODE_FEATS), dtype=jnp.float32)

    adj = (jax.random.uniform(k_adj, (N, N)) < 0.1).astype(jnp.float32)  # adj[dst, src]
    # carve block structure so the compressed grid actually skips work:
    adj = adj.at[256:512, 256:512].set(0.0)   # row tile 1: its middle col tile is empty
    adj = adj.at[512:, :].set(0.0)            # row tile 2: zero in-degree (residual only)

    # dense edge features, lane-dense [De, N, N], zero off-edge, bf16 in HBM
    edge_feat_dT = (jax.random.normal(k_edge, (EDGE_FEATS, N, N), dtype=jnp.float32)
                    * adj[None, :, :]).astype(jnp.bfloat16)

    params = init_params(k_param, NODE_FEATS, EDGE_FEATS, OUT_FEATS, N_HEADS)

    out = gipa_forward(feat_src, adj, edge_feat_dT, params,
                       n_heads=N_HEADS, out_feats=OUT_FEATS, tm=256, tn=256)
    out = jax.block_until_ready(out)

    ref = gipa_reference(feat_src, adj, edge_feat_dT, params,
                         n_heads=N_HEADS, out_feats=OUT_FEATS)
    assert out.shape == (N, N_HEADS, OUT_FEATS)
    assert jnp.allclose(out, ref, rtol=1e-2, atol=2e-2), "mismatch vs reference"

    print("KERNEL_OK")
</pallas_src>

<mosaic_0001>
module attributes {stable_mosaic.version = 11 : i64} {
  func.func @gipa_proj_kernel(%arg0: i32, %arg1: memref<256x16xf32, #tpu.memory_space<vmem>>, %arg2: memref<16x68xf32, #tpu.memory_space<vmem>>, %arg3: memref<1x32xf32, #tpu.memory_space<vmem>>, %arg4: memref<256x32xbf16, #tpu.memory_space<vmem>>, %arg5: memref<256x32xf32, #tpu.memory_space<vmem>>, %arg6: memref<256x4xf32, #tpu.memory_space<vmem>>) attributes {dimension_semantics = [#tpu.dimension_semantics<parallel>], iteration_bounds = array<i64: 3>, scalar_prefetch = 0 : i64, scratch_operands = 0 : i64, tpu.core_type = #tpu.core_type<tc>, window_params = [{transform_indices = @transform_0, window_bounds = array<i64: 256, 16>}, {pipeline_mode = #tpu.pipeline_mode<synchronous>, transform_indices = @transform_1, window_bounds = array<i64: 16, 68>}, {pipeline_mode = #tpu.pipeline_mode<synchronous>, transform_indices = @transform_2, window_bounds = array<i64: 1, 32>}, {transform_indices = @transform_3, window_bounds = array<i64: 256, 32>}, {transform_indices = @transform_4, window_bounds = array<i64: 256, 32>}, {transform_indices = @transform_5, window_bounds = array<i64: 256, 4>}]} {
    %c0 = arith.constant 0 : index
    %c0_0 = arith.constant 0 : index
    %0 = vector.load %arg1[%c0, %c0_0] : memref<256x16xf32, #tpu.memory_space<vmem>>, vector<256x16xf32>
    %c0_1 = arith.constant 0 : index
    %c0_2 = arith.constant 0 : index
    %1 = vector.load %arg2[%c0_1, %c0_2] : memref<16x68xf32, #tpu.memory_space<vmem>>, vector<16x68xf32>
    %cst = arith.constant dense<0.000000e+00> : vector<256x68xf32>
    %2 = tpu.matmul %0, %1, %cst {dimension_numbers = #tpu.dot_dimension_numbers<[1], [0], [0], [1], [0, 0, 1, 1], [], []>} : vector<256x16xf32>, vector<16x68xf32>, vector<256x68xf32> -> vector<256x68xf32>
    %3 = vector.extract_strided_slice %2 {offsets = [0, 0], sizes = [256, 32], strides = [1, 1]} : vector<256x68xf32> to vector<256x32xf32>
    %4 = arith.truncf %3 : vector<256x32xf32> to vector<256x32xbf16>
    %c0_3 = arith.constant 0 : index
    %c0_4 = arith.constant 0 : index
    %5 = vector.load %arg4[%c0_3, %c0_4] : memref<256x32xbf16, #tpu.memory_space<vmem>>, vector<256x32xbf16>
    tpu.vector_store %arg4[%c0_3, %c0_4], %4 {strides = array<i32>} : memref<256x32xbf16, #tpu.memory_space<vmem>>, vector<256x32xbf16>,
    %6 = vector.extract_strided_slice %2 {offsets = [0, 32], sizes = [256, 32], strides = [1, 1]} : vector<256x68xf32> to vector<256x32xf32>
    %c0_5 = arith.constant 0 : index
    %c0_6 = arith.constant 0 : index
    %7 = vector.load %arg3[%c0_5, %c0_6] : memref<1x32xf32, #tpu.memory_space<vmem>>, vector<1x32xf32>
    %8 = vector.broadcast %7 : vector<1x32xf32> to vector<256x32xf32>
    %9 = arith.addf %6, %8 : vector<256x32xf32>
    %c0_7 = arith.constant 0 : index
    %c0_8 = arith.constant 0 : index
    %10 = vector.load %arg5[%c0_7, %c0_8] : memref<256x32xf32, #tpu.memory_space<vmem>>, vector<256x32xf32>
    tpu.vector_store %arg5[%c0_7, %c0_8], %9 {strides = array<i32>} : memref<256x32xf32, #tpu.memory_space<vmem>>, vector<256x32xf32>,
    %11 = vector.extract_strided_slice %2 {offsets = [0, 64], sizes = [256, 4], strides = [1, 1]} : vector<256x68xf32> to vector<256x4xf32>
    %c0_9 = arith.constant 0 : index
    %c0_10 = arith.constant 0 : index
    %12 = vector.load %arg6[%c0_9, %c0_10] : memref<256x4xf32, #tpu.memory_space<vmem>>, vector<256x4xf32>
    tpu.vector_store %arg6[%c0_9, %c0_10], %11 {strides = array<i32>} : memref<256x4xf32, #tpu.memory_space<vmem>>, vector<256x4xf32>,
    return
  }
  func.func @transform_0(%arg0: i32) -> (i32, i32) {
    %c0_i32 = arith.constant 0 : i32
    %c0_i32_0 = arith.constant 0 : i32
    return %arg0, %c0_i32 : i32, i32
  }
  func.func @transform_1(%arg0: i32) -> (i32, i32) {
    %c0_i32 = arith.constant 0 : i32
    %c0_i32_0 = arith.constant 0 : i32
    %c0_i32_1 = arith.constant 0 : i32
    return %c0_i32, %c0_i32_0 : i32, i32
  }
  func.func @transform_2(%arg0: i32) -> (i32, i32) {
    %c0_i32 = arith.constant 0 : i32
    %c0_i32_0 = arith.constant 0 : i32
    %c0_i32_1 = arith.constant 0 : i32
    return %c0_i32, %c0_i32_0 : i32, i32
  }
  func.func @transform_3(%arg0: i32) -> (i32, i32) {
    %c0_i32 = arith.constant 0 : i32
    %c0_i32_0 = arith.constant 0 : i32
    return %arg0, %c0_i32 : i32, i32
  }
  func.func @transform_4(%arg0: i32) -> (i32, i32) {
    %c0_i32 = arith.constant 0 : i32
    %c0_i32_0 = arith.constant 0 : i32
    return %arg0, %c0_i32 : i32, i32
  }
  func.func @transform_5(%arg0: i32) -> (i32, i32) {
    %c0_i32 = arith.constant 0 : i32
    %c0_i32_0 = arith.constant 0 : i32
    return %arg0, %c0_i32 : i32, i32
  }
}

</mosaic_0001>

<bundles_post_ra>
// kernel: tpu_custom_call.1
= control target key start
LH: loop header
LB: loop body
LE: loop exit
PB: predicated region body
PF: predicated region fallthrough
CT: control target
= control target key end

     0   :  { %s1515_s18 = smov 0   ;;  %s2086_s0 = inlined_call_operand.vmem [shape: f32[768,16], index: 0, kind: input, shape index: {}]   ;;  %s2087_s1 = inlined_call_operand.vmem [shape: f32[16,68], index: 1, kind: input, shape index: {}]   ;;  %s2088_s2 = inlined_call_operand.vmem [shape: f32[1,32], index: 2, kind: input, shape index: {}]   ;;  %s2089_s3 = inlined_call_operand.vmem [shape: bf16[768,32], index: 3, kind: output, shape index: {0}]   ;;  %s2090_s4 = inlined_call_operand.vmem [shape: f32[768,32], index: 4, kind: output, shape index: {1}]   ;;  %s2091_s5 = inlined_call_operand.vmem [shape: f32[768,4], index: 5, kind: output, shape index: {2}]  }
   0x1 LB: > { %s1259_s19 = sadd.s32 4294967295, %s1480_s18   ;;  %p1263_p0 = scmp.ge.s32.totalorder %s1480_s18, 1  ;;  %s1480_s18 = sphi %s1515_s18, %s16_s18  }
   0x2   : > { %p193_p1 = scmp.lt.s32.totalorder %s1480_s18, 4 }
   0x4   : > { %p194_p2 = pnand %p1263_p0, %p193_p1 }
   0x5   : > { %v287_v0 = vld [vmem:[%s2087_s1] sm:$0xff] (!%p194_p2)  ;;  %v288_v1 = vld [vmem:[%s2087_s1 + $0x8] sm:$0xff] (!%p194_p2)  ;;  %s1264_s24 = sshll.u32 (!%p194_p2), %s1259_s19, 5  ;;  %s1482_s27 = smov (!%p194_p2), 32   ;;  %vm289_vm0 = vcmask (!%p194_p2), 130048   ;;  %vm739_vm1 = vcmask (!%p194_p2), 257024  }
   0x6   : > { %197 = sbr.rel (%p194_p2) target bundleno = 471 (0x1d7), region = 32  ;;  %v1336_v2 = vld [vmem:[%s2088_s2] ss:$0 sm:$0xff] (!%p194_p2)  ;;  %v1457_v3 = vpack.c.bf16 (!%p194_p2), %v288_v1, %v287_v0  ;;  %p232_p3 = scmp.lt.s32.totalorder (!%p194_p2), %s1264_s24, 95  ;;  %vm1102_vm2 = vcmask (!%p194_p2), 31744   ;;  %vm941_vm3 = vcmask (!%p194_p2), 261120  }
   0x7   : > { %778 = vrot.lane.b32.xlu0 (!%p194_p2), %v1336_v2, %s1482_s27  ;;  %s1483_s11 = smov (!%p194_p2), 64   ;;  %s1484_s12 = smov (!%p194_p2), 96  }
   0x8   : > { %1458 = vmatprep.subr.bf16.mxu0 (!%p194_p2), %v1457_v3  ;;  %1461 = vmatprep.subr.bf16.mxu1 (!%p194_p2), %v1457_v3 }
   0x9   : > { %1460 = vmatpush3.bf16.msra.mxu0 (!%p194_p2), %v1457_v3  ;;  %1462 = vmatpush3.bf16.msra.mxu1 (!%p194_p2), %v1457_v3 }
   0xd   : > { %s2093_s24 = smov (!%p232_p3, %s1264_s24), 95 }
   0xe   : > { %s1535_s28 = sshll.u32 %s2093_s24, 3  ;;  %s1267_s7 = sshll.u32 %s2093_s24, 2 }
   0xf   : > { %s1541_s6 = scalar_lea.vmem %s2086_s0, %s1535_s28  ;;  %s1611_s10 = scalar_lea.vmem %s2089_s3, %s1267_s7 }
  0x10   : > { %v255_v4 = vld [vmem:[%s1541_s6] sm:$0xff]  ;;  %v256_v6 = vld [vmem:[%s1541_s6 + $0x8] sm:$0xff]  ;;  %v257_v8 = vld [vmem:[%s1541_s6 + $0x10] sm:$0xff]  ;;  %s1929_s15 = scalar_lea.vmem %s2091_s5, %s1535_s28  ;;  %s1956_s19 = scalar_lea.vmem %s2090_s4, %s1535_s28 }
  0x11   : > { %v271_v5 = vld [vmem:[%s1541_s6 + $0x80] sm:$0xff]  ;;  %1409 = vmatprep.mubr.msk.f32.mxu0 %vm289_vm0, %v255_v4  ;;  %v272_v7 = vld [vmem:[%s1541_s6 + $0x88] sm:$0xff]  ;;  %v273_v9 = vld [vmem:[%s1541_s6 + $0x90] sm:$0xff] }
  0x12   : > { %1433 = vmatprep.mubr.msk.f32.mxu1 %vm289_vm0, %v271_v5  ;;  %1410 = vmatmul.mubr.msk.f32.vlgmr.msra.gmra.mrb[0].mxu0 %vm289_vm0, %v256_v6  ;;  %v258_v10 = vld [vmem:[%s1541_s6 + $0x18] sm:$0xff]  ;;  %v259_v12 = vld [vmem:[%s1541_s6 + $0x20] sm:$0xff]  ;;  %v260_v14 = vld [vmem:[%s1541_s6 + $0x28] sm:$0xff] }
  0x13   : > { %1434 = vmatmul.mubr.msk.f32.vlgmr.msra.gmra.mrb[0].mxu1 %vm289_vm0, %v272_v7  ;;  %1412 = vmatprep.mubr.msk.f32.mxu0 %vm289_vm0, %v257_v8  ;;  %v274_v11 = vld [vmem:[%s1541_s6 + $0x98] sm:$0xff]  ;;  %v275_v13 = vld [vmem:[%s1541_s6 + $0xa0] sm:$0xff]  ;;  %v276_v15 = vld [vmem:[%s1541_s6 + $0xa8] sm:$0xff] }
  0x14   : > { %1436 = vmatprep.mubr.msk.f32.mxu1 %vm289_vm0, %v273_v9  ;;  %v261_v16 = vld [vmem:[%s1541_s6 + $0x30] sm:$0xff]  ;;  %v262_v18 = vld [vmem:[%s1541_s6 + $0x38] sm:$0xff]  ;;  %v263_v20 = vld [vmem:[%s1541_s6 + $0x40] sm:$0xff] }
  0x15   : > { %v277_v17 = vld [vmem:[%s1541_s6 + $0xb0] sm:$0xff]  ;;  %v278_v19 = vld [vmem:[%s1541_s6 + $0xb8] sm:$0xff]  ;;  %v279_v21 = vld [vmem:[%s1541_s6 + $0xc0] sm:$0xff] }
  0x16   : > { %1413 = vmatmul.mubr.msk.f32.gmra.mrb[2].mxu0 %vm289_vm0, %v258_v10  ;;  %v264_v22 = vld [vmem:[%s1541_s6 + $0x48] sm:$0xff]  ;;  %v265_v24 = vld [vmem:[%s1541_s6 + $0x50] sm:$0xff]  ;;  %v266_v26 = vld [vmem:[%s1541_s6 + $0x58] sm:$0xff] }
  0x17   : > { %1437 = vmatmul.mubr.msk.f32.gmra.mrb[2].mxu1 %vm289_vm0, %v274_v11  ;;  %1415 = vmatprep.mubr.msk.f32.mxu0 %vm289_vm0, %v259_v12  ;;  %v280_v23 = vld [vmem:[%s1541_s6 + $0xc8] sm:$0xff]  ;;  %v281_v25 = vld [vmem:[%s1541_s6 + $0xd0] sm:$0xff]  ;;  %v282_v27 = vld [vmem:[%s1541_s6 + $0xd8] sm:$0xff] }
  0x18   : > { %1439 = vmatprep.mubr.msk.f32.mxu1 %vm289_vm0, %v275_v13  ;;  %v267_v28 = vld [vmem:[%s1541_s6 + $0x60] sm:$0xff]  ;;  %v268_v30 = vld [vmem:[%s1541_s6 + $0x68] sm:$0xff]  ;;  %v269_v32 = vld [vmem:[%s1541_s6 + $0x70] sm:$0xff] }
  0x19   : > { %v283_v29 = vld [vmem:[%s1541_s6 + $0xe0] sm:$0xff]  ;;  %v284_v31 = vld [vmem:[%s1541_s6 + $0xe8] sm:$0xff]  ;;  %v285_v33 = vld [vmem:[%s1541_s6 + $0xf0] sm:$0xff] }
  0x1a   : > { %1416 = vmatmul.mubr.msk.f32.gmra.mrb[4].mxu0 %vm289_vm0, %v260_v14  ;;  %v270_v34 = vld [vmem:[%s1541_s6 + $0x78] sm:$0xff] }
  0x1b   : > { %1440 = vmatmul.mubr.msk.f32.gmra.mrb[4].mxu1 %vm289_vm0, %v276_v15  ;;  %1418 = vmatprep.mubr.msk.f32.mxu0 %vm289_vm0, %v261_v16  ;;  %v286_v35 = vld [vmem:[%s1541_s6 + $0xf8] sm:$0xff] }
  0x1c   : > { %1442 = vmatprep.mubr.msk.f32.mxu1 %vm289_vm0, %v277_v17 }
  0x1e   : > { %1419 = vmatmul.mubr.msk.f32.gmra.mrb[6].mxu0 %vm289_vm0, %v262_v18 }
  0x1f   : > { %1443 = vmatmul.mubr.msk.f32.gmra.mrb[6].mxu1 %vm289_vm0, %v278_v19  ;;  %1421 = vmatprep.mubr.msk.f32.mxu0 %vm289_vm0, %v263_v20 }
  0x20   : > { %1445 = vmatprep.mubr.msk.f32.mxu1 %vm289_vm0, %v279_v21 }
  0x22   : > { %1422 = vmatmul.mubr.msk.f32.gmra.mrb[8].mxu0 %vm289_vm0, %v264_v22 }
  0x23   : > { %1446 = vmatmul.mubr.msk.f32.gmra.mrb[8].mxu1 %vm289_vm0, %v280_v23  ;;  %1424 = vmatprep.mubr.msk.f32.mxu0 %vm289_vm0, %v265_v24 }
  0x24   : > { %1448 = vmatprep.mubr.msk.f32.mxu1 %vm289_vm0, %v281_v25 }
  0x26   : > { %1425 = vmatmul.mubr.msk.f32.gmra.mrb[10].mxu0 %vm289_vm0, %v266_v26 }
  0x27   : > { %1449 = vmatmul.mubr.msk.f32.gmra.mrb[10].mxu1 %vm289_vm0, %v282_v27  ;;  %1427 = vmatprep.mubr.msk.f32.mxu0 %vm289_vm0, %v267_v28 }
  0x28   : > { %1451 = vmatprep.mubr.msk.f32.mxu1 %vm289_vm0, %v283_v29 }
  0x2a   : > { %1428 = vmatmul.mubr.msk.f32.gmra.mrb[12].mxu0 %vm289_vm0, %v268_v30 }
  0x2b   : > { %1452 = vmatmul.mubr.msk.f32.gmra.mrb[12].mxu1 %vm289_vm0, %v284_v31  ;;  %1430 = vmatprep.mubr.msk.f32.mxu0 %vm289_vm0, %v269_v32 }
  0x2c   : > { %1454 = vmatprep.mubr.msk.f32.mxu1 %vm289_vm0, %v285_v33 }
  0x2e   : > { %1431 = vmatmul.mubr.msk.f32.gmra.mrb[14].mxu0 %vm289_vm0, %v270_v34 }
  0x2f   : > { %1455 = vmatmul.mubr.msk.f32.gmra.mrb[14].mxu1 %vm289_vm0, %v286_v35 }
  0x79   : > { %v1615_v44 = vpop.permute.xlu0 %778 }
  0xe5   : > { %v1411_v36 = vpop.f32.mrb[0].mxu0 }
  0xe6   : > { %v1435_v37 = vpop.f32.mrb[0].mxu1  ;;  %v1340_v38 = vpack.c.bf16 %v1411_v36, %v1411_v36  ;;  %1008 = vrot.lane.b32.xlu0 %v1411_v36, %s1483_s11  ;;  %v452_v39 = vpop.f32.mrb[1].mxu0  ;;  %v782_v54 = vadd.f32 %v1411_v36, %v1615_v44 }
  0xe7   : > { %v1356_v40 = vpack.c.bf16 %v1435_v37, %v1435_v37  ;;  %v532_v41 = vpop.f32.mrb[1].mxu1  ;;  %v1339_v42 = vpack.c.bf16 %v452_v39, %v452_v39  ;;  %1006 = vrot.lane.b32.xlu1 %v452_v39, %s1483_s11  ;;  %v798_v53 = vadd.f32 %v1435_v37, %v1615_v44  ;;  %v781_v63 = vadd.f32 %v1615_v44, %v452_v39 }
  0xe8   : > { %v1355_v43 = vpack.c.bf16 %v532_v41, %v532_v41  ;;  %741 = vst.msk [vmem:[%s1611_s10 + $0x4] sm:$0xf] %vm739_vm1, %v1340_v38  ;;  %v797_v0 = vadd.f32 %v1615_v44, %v532_v41 }
  0xe9   : > { %757 = vst.msk [vmem:[%s1611_s10 + $0x44] sm:$0xf] %vm739_vm1, %v1356_v40  ;;  %740 = vst.msk [vmem:[%s1611_s10] sm:$0xf] %vm739_vm1, %v1339_v42  ;;  %v1627_v46 = vpop.f32.mrb[2].mxu0 }
  0xea   : > { %756 = vst.msk [vmem:[%s1611_s10 + $0x40] sm:$0xf] %vm739_vm1, %v1355_v43  ;;  %v1625_v45 = vpop.f32.mrb[2].mxu1  ;;  %1040 = vrot.lane.b32.xlu0 %v1435_v37, %s1483_s11  ;;  %v1342_v48 = vpack.c.bf16 %v1627_v46, %v1627_v46  ;;  %v1634_v49 = vpop.f32.mrb[3].mxu0  ;;  %v784_v25 = vadd.f32 %v1627_v46, %v1615_v44 }
  0xeb   : > { %v1358_v47 = vpack.c.bf16 %v1625_v45, %v1625_v45  ;;  %v1636_v50 = vpop.f32.mrb[3].mxu1  ;;  %1038 = vrot.lane.b32.xlu1 %v532_v41, %s1483_s11  ;;  %v1341_v51 = vpack.c.bf16 %v1634_v49, %v1634_v49  ;;  %v783_v26 = vadd.f32 %v1615_v44, %v1634_v49  ;;  %v800_v35 = vadd.f32 %v1625_v45, %v1615_v44 }
  0xec   : > { %v1357_v52 = vpack.c.bf16 %v1636_v50, %v1636_v50  ;;  %743 = vst.msk [vmem:[%s1611_s10 + $0xc] sm:$0xf] %vm739_vm1, %v1342_v48  ;;  %v799_v36 = vadd.f32 %v1615_v44, %v1636_v50 }
  0xed   : > { %759 = vst.msk [vmem:[%s1611_s10 + $0x4c] sm:$0xf] %vm739_vm1, %v1358_v47  ;;  %742 = vst.msk [vmem:[%s1611_s10 + $0x8] sm:$0xf] %vm739_vm1, %v1341_v51  ;;  %v1653_v55 = vpop.f32.mrb[4].mxu0 }
  0xee   : > { %758 = vst.msk [vmem:[%s1611_s10 + $0x48] sm:$0xf] %vm739_vm1, %v1357_v52  ;;  %v1655_v56 = vpop.f32.mrb[4].mxu1  ;;  %v1344_v57 = vpack.c.bf16 %v1653_v55, %v1653_v55  ;;  %879 = vrot.lane.b32.xlu0 %v798_v53, %s1484_s12  ;;  %v1664_v60 = vpop.f32.mrb[5].mxu0 }
  0xef   : > { %v1360_v58 = vpack.c.bf16 %v1655_v56, %v1655_v56  ;;  %v1661_v59 = vpop.f32.mrb[5].mxu1  ;;  %v1343_v62 = vpack.c.bf16 %v1664_v60, %v1664_v60  ;;  %847 = vrot.lane.b32.xlu1 %v782_v54, %s1484_s12  ;;  %v785_v47 = vadd.f32 %v1615_v44, %v1664_v60  ;;  %v802_v48 = vadd.f32 %v1655_v56, %v1615_v44 }
  0xf0   : > { %v1359_v61 = vpack.c.bf16 %v1661_v59, %v1661_v59  ;;  %745 = vst.msk [vmem:[%s1611_s10 + $0x14] sm:$0xf] %vm739_vm1, %v1344_v57 }
  0xf1   : > { %761 = vst.msk [vmem:[%s1611_s10 + $0x54] sm:$0xf] %vm739_vm1, %v1360_v58  ;;  %744 = vst.msk [vmem:[%s1611_s10 + $0x10] sm:$0xf] %vm739_vm1, %v1343_v62  ;;  %v1681_v1 = vpop.f32.mrb[6].mxu0 }
  0xf2   : > { %760 = vst.msk [vmem:[%s1611_s10 + $0x50] sm:$0xf] %vm739_vm1, %v1359_v61  ;;  %v1683_v2 = vpop.f32.mrb[6].mxu1  ;;  %v1346_v3 = vpack.c.bf16 %v1681_v1, %v1681_v1  ;;  %845 = vrot.lane.b32.xlu0 %v781_v63, %s1484_s12  ;;  %v1692_v6 = vpop.f32.mrb[7].mxu0 }
  0xf3   : > { %v1362_v4 = vpack.c.bf16 %v1683_v2, %v1683_v2  ;;  %v1689_v5 = vpop.f32.mrb[7].mxu1  ;;  %v1345_v8 = vpack.c.bf16 %v1692_v6, %v1692_v6  ;;  %877 = vrot.lane.b32.xlu1 %v797_v0, %s1484_s12  ;;  %v787_v51 = vadd.f32 %v1615_v44, %v1692_v6  ;;  %v804_v52 = vadd.f32 %v1683_v2, %v1615_v44 }
  0xf4   : > { %v1361_v7 = vpack.c.bf16 %v1689_v5, %v1689_v5  ;;  %747 = vst.msk [vmem:[%s1611_s10 + $0x1c] sm:$0xf] %vm739_vm1, %v1346_v3  ;;  %v803_v53 = vadd.f32 %v1615_v44, %v1689_v5 }
  0xf5   : > { %763 = vst.msk [vmem:[%s1611_s10 + $0x5c] sm:$0xf] %vm739_vm1, %v1362_v4  ;;  %746 = vst.msk [vmem:[%s1611_s10 + $0x18] sm:$0xf] %vm739_vm1, %v1345_v8  ;;  %v1707_v9 = vpop.f32.mrb[8].mxu0 }
  0xf6   : > { %762 = vst.msk [vmem:[%s1611_s10 + $0x58] sm:$0xf] %vm739_vm1, %v1361_v7  ;;  %v1709_v10 = vpop.f32.mrb[8].mxu1  ;;  %v1348_v11 = vpack.c.bf16 %v1707_v9, %v1707_v9  ;;  %1012 = vrot.lane.b32.xlu0 %v1627_v46, %s1483_s11  ;;  %v1719_v14 = vpop.f32.mrb[9].mxu0  ;;  %v786_v46 = vadd.f32 %v1653_v55, %v1615_v44  ;;  %v790_v54 = vadd.f32 %v1707_v9, %v1615_v44 }
  0xf7   : > { %v1364_v12 = vpack.c.bf16 %v1709_v10, %v1709_v10  ;;  %v1715_v13 = vpop.f32.mrb[9].mxu1  ;;  %v1347_v16 = vpack.c.bf16 %v1719_v14, %v1719_v14  ;;  %1010 = vrot.lane.b32.xlu1 %v1634_v49, %s1483_s11  ;;  %v801_v49 = vadd.f32 %v1615_v44, %v1661_v59 }
  0xf8   : > { %v1363_v15 = vpack.c.bf16 %v1715_v13, %v1715_v13  ;;  %749 = vst.msk [vmem:[%s1611_s10 + $0x24] sm:$0xf] %vm739_vm1, %v1348_v11  ;;  %v805_v57 = vadd.f32 %v1615_v44, %v1715_v13 }
  0xf9   : > { %765 = vst.msk [vmem:[%s1611_s10 + $0x64] sm:$0xf] %vm739_vm1, %v1364_v12  ;;  %748 = vst.msk [vmem:[%s1611_s10 + $0x20] sm:$0xf] %vm739_vm1, %v1347_v16  ;;  %v1735_v17 = vpop.f32.mrb[10].mxu0 }
  0xfa   : > { %764 = vst.msk [vmem:[%s1611_s10 + $0x60] sm:$0xf] %vm739_vm1, %v1363_v15  ;;  %v1737_v18 = vpop.f32.mrb[10].mxu1  ;;  %v1350_v19 = vpack.c.bf16 %v1735_v17, %v1735_v17  ;;  %1044 = vrot.lane.b32.xlu0 %v1625_v45, %s1483_s11  ;;  %v1747_v22 = vpop.f32.mrb[11].mxu0  ;;  %v792_v58 = vadd.f32 %v1735_v17, %v1615_v44 }
  0xfb   : > { %v1366_v20 = vpack.c.bf16 %v1737_v18, %v1737_v18  ;;  %v1743_v21 = vpop.f32.mrb[11].mxu1  ;;  %v1349_v24 = vpack.c.bf16 %v1747_v22, %v1747_v22  ;;  %1042 = vrot.lane.b32.xlu1 %v1636_v50, %s1483_s11  ;;  %v788_v50 = vadd.f32 %v1681_v1, %v1615_v44 }
  0xfc   : > { %v1365_v23 = vpack.c.bf16 %v1743_v21, %v1743_v21  ;;  %751 = vst.msk [vmem:[%s1611_s10 + $0x2c] sm:$0xf] %vm739_vm1, %v1350_v19  ;;  %v807_v61 = vadd.f32 %v1615_v44, %v1743_v21 }
  0xfd   : > { %767 = vst.msk [vmem:[%s1611_s10 + $0x6c] sm:$0xf] %vm739_vm1, %v1366_v20  ;;  %750 = vst.msk [vmem:[%s1611_s10 + $0x28] sm:$0xf] %vm739_vm1, %v1349_v24  ;;  %v1767_v27 = vpop.f32.mrb[12].mxu0 }
  0xfe   : > { %766 = vst.msk [vmem:[%s1611_s10 + $0x68] sm:$0xf] %vm739_vm1, %v1365_v23  ;;  %v1769_v28 = vpop.f32.mrb[12].mxu1  ;;  %v1352_v29 = vpack.c.bf16 %v1767_v27, %v1767_v27  ;;  %851 = vrot.lane.b32.xlu0 %v784_v25, %s1484_s12  ;;  %v1778_v32 = vpop.f32.mrb[13].mxu0  ;;  %v794_v62 = vadd.f32 %v1767_v27, %v1615_v44 }
  0xff   : > { %v1368_v30 = vpack.c.bf16 %v1769_v28, %v1769_v28  ;;  %v1775_v31 = vpop.f32.mrb[13].mxu1  ;;  %v1351_v34 = vpack.c.bf16 %v1778_v32, %v1778_v32  ;;  %849 = vrot.lane.b32.xlu1 %v783_v26, %s1484_s12  ;;  %v793_v63 = vadd.f32 %v1615_v44, %v1778_v32  ;;  %v810_v0 = vadd.f32 %v1769_v28, %v1615_v44 }
 0x100   : > { %v1367_v33 = vpack.c.bf16 %v1775_v31, %v1775_v31  ;;  %753 = vst.msk [vmem:[%s1611_s10 + $0x34] sm:$0xf] %vm739_vm1, %v1352_v29 }
 0x101   : > { %769 = vst.msk [vmem:[%s1611_s10 + $0x74] sm:$0xf] %vm739_vm1, %v1368_v30  ;;  %752 = vst.msk [vmem:[%s1611_s10 + $0x30] sm:$0xf] %vm739_vm1, %v1351_v34  ;;  %v1797_v37 = vpop.f32.mrb[14].mxu0 }
 0x102   : > { %768 = vst.msk [vmem:[%s1611_s10 + $0x70] sm:$0xf] %vm739_vm1, %v1367_v33  ;;  %v1799_v38 = vpop.f32.mrb[14].mxu1  ;;  %v1354_v39 = vpack.c.bf16 %v1797_v37, %v1797_v37  ;;  %883 = vrot.lane.b32.xlu0 %v800_v35, %s1484_s12  ;;  %v1808_v42 = vpop.f32.mrb[15].mxu0 }
 0x103   : > { %v1370_v40 = vpack.c.bf16 %v1799_v38, %v1799_v38  ;;  %v1805_v41 = vpop.f32.mrb[15].mxu1  ;;  %v1353_v45 = vpack.c.bf16 %v1808_v42, %v1808_v42  ;;  %881 = vrot.lane.b32.xlu1 %v799_v36, %s1484_s12  ;;  %v795_v4 = vadd.f32 %v1615_v44, %v1808_v42 }
 0x104   : > { %v1369_v43 = vpack.c.bf16 %v1805_v41, %v1805_v41  ;;  %755 = vst.msk [vmem:[%s1611_s10 + $0x3c] sm:$0xf] %vm739_vm1, %v1354_v39  ;;  %v811_v8 = vadd.f32 %v1615_v44, %v1805_v41 }
 0x105   : > { %771 = vst.msk [vmem:[%s1611_s10 + $0x7c] sm:$0xf] %vm739_vm1, %v1370_v40  ;;  %754 = vst.msk [vmem:[%s1611_s10 + $0x38] sm:$0xf] %vm739_vm1, %v1353_v45 }
 0x106   : > { %770 = vst.msk [vmem:[%s1611_s10 + $0x78] sm:$0xf] %vm739_vm1, %v1369_v43  ;;  %1016 = vrot.lane.b32.xlu0 %v1653_v55, %s1483_s11  ;;  %v789_v55 = vadd.f32 %v1615_v44, %v1719_v14 }
 0x107   : > { %1014 = vrot.lane.b32.xlu1 %v1664_v60, %s1483_s11  ;;  %v808_v60 = vadd.f32 %v1737_v18, %v1615_v44 }
 0x10a   : > { %1048 = vrot.lane.b32.xlu0 %v1655_v56, %s1483_s11  ;;  %v806_v56 = vadd.f32 %v1709_v10, %v1615_v44 }
 0x10b   : > { %1046 = vrot.lane.b32.xlu1 %v1661_v59, %s1483_s11  ;;  %v791_v59 = vadd.f32 %v1615_v44, %v1747_v22 }
 0x10e   : > { %855 = vrot.lane.b32.xlu0 %v786_v46, %s1484_s12 }
 0x10f   : > { %853 = vrot.lane.b32.xlu1 %v785_v47, %s1484_s12 }
 0x112   : > { %887 = vrot.lane.b32.xlu0 %v802_v48, %s1484_s12 }
 0x113   : > { %885 = vrot.lane.b32.xlu1 %v801_v49, %s1484_s12 }
 0x116   : > { %1020 = vrot.lane.b32.xlu0 %v1681_v1, %s1483_s11  ;;  %v809_v1 = vadd.f32 %v1615_v44, %v1775_v31 }
 0x117   : > { %1018 = vrot.lane.b32.xlu1 %v1692_v6, %s1483_s11  ;;  %v812_v6 = vadd.f32 %v1799_v38, %v1615_v44 }
 0x11a   : > { %1052 = vrot.lane.b32.xlu0 %v1683_v2, %s1483_s11  ;;  %v796_v2 = vadd.f32 %v1797_v37, %v1615_v44 }
 0x11b   : > { %1050 = vrot.lane.b32.xlu1 %v1689_v5, %s1483_s11 }
 0x11e   : > { %859 = vrot.lane.b32.xlu0 %v788_v50, %s1484_s12 }
 0x11f   : > { %857 = vrot.lane.b32.xlu1 %v787_v51, %s1484_s12 }
 0x122   : > { %891 = vrot.lane.b32.xlu0 %v804_v52, %s1484_s12 }
 0x123   : > { %889 = vrot.lane.b32.xlu1 %v803_v53, %s1484_s12 }
 0x126   : > { %1024 = vrot.lane.b32.xlu0 %v1707_v9, %s1483_s11 }
 0x127   : > { %1022 = vrot.lane.b32.xlu1 %v1719_v14, %s1483_s11 }
 0x12a   : > { %1056 = vrot.lane.b32.xlu0 %v1709_v10, %s1483_s11 }
 0x12b   : > { %1054 = vrot.lane.b32.xlu1 %v1715_v13, %s1483_s11 }
 0x12e   : > { %863 = vrot.lane.b32.xlu0 %v790_v54, %s1484_s12 }
 0x12f   : > { %861 = vrot.lane.b32.xlu1 %v789_v55, %s1484_s12 }
 0x132   : > { %895 = vrot.lane.b32.xlu0 %v806_v56, %s1484_s12 }
 0x133   : > { %893 = vrot.lane.b32.xlu1 %v805_v57, %s1484_s12 }
 0x136   : > { %1028 = vrot.lane.b32.xlu0 %v1735_v17, %s1483_s11 }
 0x137   : > { %1026 = vrot.lane.b32.xlu1 %v1747_v22, %s1483_s11 }
 0x13a   : > { %1060 = vrot.lane.b32.xlu0 %v1737_v18, %s1483_s11 }
 0x13b   : > { %1058 = vrot.lane.b32.xlu1 %v1743_v21, %s1483_s11 }
 0x13e   : > { %867 = vrot.lane.b32.xlu0 %v792_v58, %s1484_s12 }
 0x13f   : > { %865 = vrot.lane.b32.xlu1 %v791_v59, %s1484_s12 }
 0x142   : > { %899 = vrot.lane.b32.xlu0 %v808_v60, %s1484_s12 }
 0x143   : > { %897 = vrot.lane.b32.xlu1 %v807_v61, %s1484_s12 }
 0x146   : > { %1032 = vrot.lane.b32.xlu0 %v1767_v27, %s1483_s11 }
 0x147   : > { %1030 = vrot.lane.b32.xlu1 %v1778_v32, %s1483_s11 }
 0x14a   : > { %1064 = vrot.lane.b32.xlu0 %v1769_v28, %s1483_s11 }
 0x14b   : > { %1062 = vrot.lane.b32.xlu1 %v1775_v31, %s1483_s11 }
 0x14e   : > { %871 = vrot.lane.b32.xlu0 %v794_v62, %s1484_s12 }
 0x14f   : > { %869 = vrot.lane.b32.xlu1 %v793_v63, %s1484_s12 }
 0x152   : > { %903 = vrot.lane.b32.xlu0 %v810_v0, %s1484_s12 }
 0x153   : > { %901 = vrot.lane.b32.xlu1 %v809_v1, %s1484_s12 }
 0x156   : > { %1036 = vrot.lane.b32.xlu0 %v1797_v37, %s1483_s11 }
 0x157   : > { %1034 = vrot.lane.b32.xlu1 %v1808_v42, %s1483_s11 }
 0x158   : > { %v1009_v3 = vpop.permute.xlu0 %1008 }
 0x159   : > { %1104 = vst.msk [vmem:[%s1929_s15 + $0x8] sm:$0xff] %vm1102_vm2, %v1009_v3  ;;  %v1007_v5 = vpop.permute.xlu1 %1006 }
 0x15a   : > { %1103 = vst.msk [vmem:[%s1929_s15] sm:$0xff] %vm1102_vm2, %v1007_v5  ;;  %875 = vrot.lane.b32.xlu0 %v796_v2, %s1484_s12 }
 0x15b   : > { %873 = vrot.lane.b32.xlu1 %v795_v4, %s1484_s12 }
 0x15c   : > { %v1041_v7 = vpop.permute.xlu0 %1040 }
 0x15d   : > { %1120 = vst.msk [vmem:[%s1929_s15 + $0x88] sm:$0xff] %vm1102_vm2, %v1041_v7  ;;  %v1039_v9 = vpop.permute.xlu1 %1038 }
 0x15e   : > { %1119 = vst.msk [vmem:[%s1929_s15 + $0x80] sm:$0xff] %vm1102_vm2, %v1039_v9  ;;  %907 = vrot.lane.b32.xlu0 %v812_v6, %s1484_s12 }
 0x15f   : > { %905 = vrot.lane.b32.xlu1 %v811_v8, %s1484_s12 }
 0x160   : > { %v880_v44 = vpop.permute.xlu0 %879 }
 0x161   : > { %959 = vst.msk [vmem:[%s1956_s19 + $0x88] sm:$0xff] %vm941_vm3, %v880_v44  ;;  %v848_v10 = vpop.permute.xlu1 %847 }
 0x162   : > { %943 = vst.msk [vmem:[%s1956_s19 + $0x8] sm:$0xff] %vm941_vm3, %v848_v10  ;;  %1068 = vrot.lane.b32.xlu0 %v1799_v38, %s1483_s11 }
 0x163   : > { %1066 = vrot.lane.b32.xlu1 %v1805_v41, %s1483_s11 }
 0x164   : > { %v846_v11 = vpop.permute.xlu0 %845 }
 0x165   : > { %942 = vst.msk [vmem:[%s1956_s19] sm:$0xff] %vm941_vm3, %v846_v11  ;;  %v878_v12 = vpop.permute.xlu1 %877 }
 0x166   : > { %958 = vst.msk [vmem:[%s1956_s19 + $0x80] sm:$0xff] %vm941_vm3, %v878_v12 }
 0x168   : > { %v1013_v13 = vpop.permute.xlu0 %1012 }
 0x169   : > { %1106 = vst.msk [vmem:[%s1929_s15 + $0x18] sm:$0xff] %vm1102_vm2, %v1013_v13  ;;  %v1011_v14 = vpop.permute.xlu1 %1010 }
 0x16a   : > { %1105 = vst.msk [vmem:[%s1929_s15 + $0x10] sm:$0xff] %vm1102_vm2, %v1011_v14 }
 0x16c   : > { %v1045_v15 = vpop.permute.xlu0 %1044 }
 0x16d   : > { %1122 = vst.msk [vmem:[%s1929_s15 + $0x98] sm:$0xff] %vm1102_vm2, %v1045_v15  ;;  %v1043_v16 = vpop.permute.xlu1 %1042 }
 0x16e   : > { %1121 = vst.msk [vmem:[%s1929_s15 + $0x90] sm:$0xff] %vm1102_vm2, %v1043_v16 }
 0x170   : > { %v852_v17 = vpop.permute.xlu0 %851 }
 0x171   : > { %945 = vst.msk [vmem:[%s1956_s19 + $0x18] sm:$0xff] %vm941_vm3, %v852_v17  ;;  %v850_v18 = vpop.permute.xlu1 %849 }
 0x172   : > { %944 = vst.msk [vmem:[%s1956_s19 + $0x10] sm:$0xff] %vm941_vm3, %v850_v18 }
 0x174   : > { %v884_v19 = vpop.permute.xlu0 %883 }
 0x175   : > { %961 = vst.msk [vmem:[%s1956_s19 + $0x98] sm:$0xff] %vm941_vm3, %v884_v19  ;;  %v882_v20 = vpop.permute.xlu1 %881 }
 0x176   : > { %960 = vst.msk [vmem:[%s1956_s19 + $0x90] sm:$0xff] %vm941_vm3, %v882_v20 }
 0x178   : > { %v1017_v21 = vpop.permute.xlu0 %1016 }
 0x179   : > { %1108 = vst.msk [vmem:[%s1929_s15 + $0x28] sm:$0xff] %vm1102_vm2, %v1017_v21  ;;  %v1015_v22 = vpop.permute.xlu1 %1014 }
 0x17a   : > { %1107 = vst.msk [vmem:[%s1929_s15 + $0x20] sm:$0xff] %vm1102_vm2, %v1015_v22 }
 0x17c   : > { %v1049_v23 = vpop.permute.xlu0 %1048 }
 0x17d   : > { %1124 = vst.msk [vmem:[%s1929_s15 + $0xa8] sm:$0xff] %vm1102_vm2, %v1049_v23  ;;  %v1047_v24 = vpop.permute.xlu1 %1046 }
 0x17e   : > { %1123 = vst.msk [vmem:[%s1929_s15 + $0xa0] sm:$0xff] %vm1102_vm2, %v1047_v24 }
 0x180   : > { %v856_v25 = vpop.permute.xlu0 %855 }
 0x181   : > { %947 = vst.msk [vmem:[%s1956_s19 + $0x28] sm:$0xff] %vm941_vm3, %v856_v25  ;;  %v854_v26 = vpop.permute.xlu1 %853 }
 0x182   : > { %946 = vst.msk [vmem:[%s1956_s19 + $0x20] sm:$0xff] %vm941_vm3, %v854_v26 }
 0x184   : > { %v888_v27 = vpop.permute.xlu0 %887 }
 0x185   : > { %963 = vst.msk [vmem:[%s1956_s19 + $0xa8] sm:$0xff] %vm941_vm3, %v888_v27  ;;  %v886_v28 = vpop.permute.xlu1 %885 }
 0x186   : > { %962 = vst.msk [vmem:[%s1956_s19 + $0xa0] sm:$0xff] %vm941_vm3, %v886_v28 }
 0x188   : > { %v1021_v29 = vpop.permute.xlu0 %1020 }
 0x189   : > { %1110 = vst.msk [vmem:[%s1929_s15 + $0x38] sm:$0xff] %vm1102_vm2, %v1021_v29  ;;  %v1019_v30 = vpop.permute.xlu1 %1018 }
 0x18a   : > { %1109 = vst.msk [vmem:[%s1929_s15 + $0x30] sm:$0xff] %vm1102_vm2, %v1019_v30 }
 0x18c   : > { %v1053_v31 = vpop.permute.xlu0 %1052 }
 0x18d   : > { %1126 = vst.msk [vmem:[%s1929_s15 + $0xb8] sm:$0xff] %vm1102_vm2, %v1053_v31  ;;  %v1051_v32 = vpop.permute.xlu1 %1050 }
 0x18e   : > { %1125 = vst.msk [vmem:[%s1929_s15 + $0xb0] sm:$0xff] %vm1102_vm2, %v1051_v32 }
 0x190   : > { %v860_v33 = vpop.permute.xlu0 %859 }
 0x191   : > { %949 = vst.msk [vmem:[%s1956_s19 + $0x38] sm:$0xff] %vm941_vm3, %v860_v33  ;;  %v858_v34 = vpop.permute.xlu1 %857 }
 0x192   : > { %948 = vst.msk [vmem:[%s1956_s19 + $0x30] sm:$0xff] %vm941_vm3, %v858_v34 }
 0x194   : > { %v892_v35 = vpop.permute.xlu0 %891 }
 0x195   : > { %965 = vst.msk [vmem:[%s1956_s19 + $0xb8] sm:$0xff] %vm941_vm3, %v892_v35  ;;  %v890_v36 = vpop.permute.xlu1 %889 }
 0x196   : > { %964 = vst.msk [vmem:[%s1956_s19 + $0xb0] sm:$0xff] %vm941_vm3, %v890_v36 }
 0x198   : > { %v1025_v37 = vpop.permute.xlu0 %1024 }
 0x199   : > { %1112 = vst.msk [vmem:[%s1929_s15 + $0x48] sm:$0xff] %vm1102_vm2, %v1025_v37  ;;  %v1023_v38 = vpop.permute.xlu1 %1022 }
 0x19a   : > { %1111 = vst.msk [vmem:[%s1929_s15 + $0x40] sm:$0xff] %vm1102_vm2, %v1023_v38 }
 0x19c   : > { %v1057_v39 = vpop.permute.xlu0 %1056 }
 0x19d   : > { %1128 = vst.msk [vmem:[%s1929_s15 + $0xc8] sm:$0xff] %vm1102_vm2, %v1057_v39  ;;  %v1055_v40 = vpop.permute.xlu1 %1054 }
 0x19e   : > { %1127 = vst.msk [vmem:[%s1929_s15 + $0xc0] sm:$0xff] %vm1102_vm2, %v1055_v40 }
 0x1a0   : > { %v864_v41 = vpop.permute.xlu0 %863 }
 0x1a1   : > { %951 = vst.msk [vmem:[%s1956_s19 + $0x48] sm:$0xff] %vm941_vm3, %v864_v41  ;;  %v862_v42 = vpop.permute.xlu1 %861 }
 0x1a2   : > { %950 = vst.msk [vmem:[%s1956_s19 + $0x40] sm:$0xff] %vm941_vm3, %v862_v42 }
 0x1a4   : > { %v896_v43 = vpop.permute.xlu0 %895 }
 0x1a5   : > { %967 = vst.msk [vmem:[%s1956_s19 + $0xc8] sm:$0xff] %vm941_vm3, %v896_v43  ;;  %v894_v45 = vpop.permute.xlu1 %893 }
 0x1a6   : > { %966 = vst.msk [vmem:[%s1956_s19 + $0xc0] sm:$0xff] %vm941_vm3, %v894_v45 }
 0x1a8   : > { %v1029_v46 = vpop.permute.xlu0 %1028 }
 0x1a9   : > { %1114 = vst.msk [vmem:[%s1929_s15 + $0x58] sm:$0xff] %vm1102_vm2, %v1029_v46  ;;  %v1027_v47 = vpop.permute.xlu1 %1026 }
 0x1aa   : > { %1113 = vst.msk [vmem:[%s1929_s15 + $0x50] sm:$0xff] %vm1102_vm2, %v1027_v47 }
 0x1ac   : > { %v1061_v48 = vpop.permute.xlu0 %1060 }
 0x1ad   : > { %1130 = vst.msk [vmem:[%s1929_s15 + $0xd8] sm:$0xff] %vm1102_vm2, %v1061_v48  ;;  %v1059_v49 = vpop.permute.xlu1 %1058 }
 0x1ae   : > { %1129 = vst.msk [vmem:[%s1929_s15 + $0xd0] sm:$0xff] %vm1102_vm2, %v1059_v49 }
 0x1b0   : > { %v868_v50 = vpop.permute.xlu0 %867 }
 0x1b1   : > { %953 = vst.msk [vmem:[%s1956_s19 + $0x58] sm:$0xff] %vm941_vm3, %v868_v50  ;;  %v866_v51 = vpop.permute.xlu1 %865 }
 0x1b2   : > { %952 = vst.msk [vmem:[%s1956_s19 + $0x50] sm:$0xff] %vm941_vm3, %v866_v51 }
 0x1b4   : > { %v900_v52 = vpop.permute.xlu0 %899 }
 0x1b5   : > { %969 = vst.msk [vmem:[%s1956_s19 + $0xd8] sm:$0xff] %vm941_vm3, %v900_v52  ;;  %v898_v53 = vpop.permute.xlu1 %897 }
 0x1b6   : > { %968 = vst.msk [vmem:[%s1956_s19 + $0xd0] sm:$0xff] %vm941_vm3, %v898_v53 }
 0x1b8   : > { %v1033_v54 = vpop.permute.xlu0 %1032 }
 0x1b9   : > { %1116 = vst.msk [vmem:[%s1929_s15 + $0x68] sm:$0xff] %vm1102_vm2, %v1033_v54  ;;  %v1031_v55 = vpop.permute.xlu1 %1030 }
 0x1ba   : > { %1115 = vst.msk [vmem:[%s1929_s15 + $0x60] sm:$0xff] %vm1102_vm2, %v1031_v55 }
 0x1bc   : > { %v1065_v56 = vpop.permute.xlu0 %1064 }
 0x1bd   : > { %1132 = vst.msk [vmem:[%s1929_s15 + $0xe8] sm:$0xff] %vm1102_vm2, %v1065_v56  ;;  %v1063_v57 = vpop.permute.xlu1 %1062 }
 0x1be   : > { %1131 = vst.msk [vmem:[%s1929_s15 + $0xe0] sm:$0xff] %vm1102_vm2, %v1063_v57 }
 0x1c0   : > { %v872_v58 = vpop.permute.xlu0 %871 }
 0x1c1   : > { %955 = vst.msk [vmem:[%s1956_s19 + $0x68] sm:$0xff] %vm941_vm3, %v872_v58  ;;  %v870_v59 = vpop.permute.xlu1 %869 }
 0x1c2   : > { %954 = vst.msk [vmem:[%s1956_s19 + $0x60] sm:$0xff] %vm941_vm3, %v870_v59 }
 0x1c4   : > { %v904_v60 = vpop.permute.xlu0 %903 }
 0x1c5   : > { %971 = vst.msk [vmem:[%s1956_s19 + $0xe8] sm:$0xff] %vm941_vm3, %v904_v60  ;;  %v902_v61 = vpop.permute.xlu1 %901 }
 0x1c6   : > { %970 = vst.msk [vmem:[%s1956_s19 + $0xe0] sm:$0xff] %vm941_vm3, %v902_v61 }
 0x1c8   : > { %v1037_v62 = vpop.permute.xlu0 %1036 }
 0x1c9   : > { %1118 = vst.msk [vmem:[%s1929_s15 + $0x78] sm:$0xff] %vm1102_vm2, %v1037_v62  ;;  %v1035_v63 = vpop.permute.xlu1 %1034 }
 0x1ca   : > { %1117 = vst.msk [vmem:[%s1929_s15 + $0x70] sm:$0xff] %vm1102_vm2, %v1035_v63 }
 0x1cc   : > { %v876_v0 = vpop.permute.xlu0 %875 }
 0x1cd   : > { %957 = vst.msk [vmem:[%s1956_s19 + $0x78] sm:$0xff] %vm941_vm3, %v876_v0  ;;  %v874_v1 = vpop.permute.xlu1 %873 }
 0x1ce   : > { %956 = vst.msk [vmem:[%s1956_s19 + $0x70] sm:$0xff] %vm941_vm3, %v874_v1 }
 0x1d0   : > { %v908_v2 = vpop.permute.xlu0 %907 }
 0x1d1   : > { %973 = vst.msk [vmem:[%s1956_s19 + $0xf8] sm:$0xff] %vm941_vm3, %v908_v2  ;;  %v906_v3 = vpop.permute.xlu1 %905 }
 0x1d2   : > { %972 = vst.msk [vmem:[%s1956_s19 + $0xf0] sm:$0xff] %vm941_vm3, %v906_v3 }
 0x1d4   : > { %v1069_v4 = vpop.permute.xlu0 %1068 }
 0x1d5   : > { %1134 = vst.msk [vmem:[%s1929_s15 + $0xf8] sm:$0xff] %vm1102_vm2, %v1069_v4  ;;  %v1067_v5 = vpop.permute.xlu1 %1066 }
 0x1d6   : > { %1133 = vst.msk [vmem:[%s1929_s15 + $0xf0] sm:$0xff] %vm1102_vm2, %v1067_v5 }
 0x1d7 PF: > { %s16_s18 = sadd.s32 1, %s1480_s18  }
 0x1d8   : > { %p13_p4 = scmp.ge.s32.totalorder %s16_s18, 5  }
 0x1da   :  { %15 = sbr.rel (!%p13_p4) target bundleno = 1 (0x1), region = 86 }

</bundles_post_ra>
